<compile_context>
chip_gen: v5e
topology: v5e:2x2
jax: 0.10.0
libtpu: 0.0.40
codegen_flags: <defaults>
</compile_context>

<pallas_src>
import functools
import math

import jax
import jax.numpy as jnp
from jax import lax
from jax.experimental import pallas as pl
from jax.experimental.pallas import tpu as pltpu

MIB = 1024 * 1024


# ------------------------------ hardware helpers -----------------------------


def _tpu_generation():
    try:
        kind = jax.devices()[0].device_kind.lower()
    except Exception:
        return 0
    for tag, gen in (("v7", 7), ("7x", 7), ("v6", 6), ("v5", 5), ("v4", 4)):
        if tag in kind:
            return gen
    return 0


def _vmem_capacity_bytes():
    try:
        return int(pltpu.get_tpu_info().vmem_capacity_bytes)
    except Exception:
        pass
    gen = _tpu_generation()
    if gen in (5, 6):
        return 128 * MIB
    return 64 * MIB      # conservative (v7x / unknown)


def _vmem_budget(vmem_cap):
    # Headroom for Mosaic-internal scratch: ~52 MiB on v7x, ~100 MiB on v5e/v6e.
    return max(24 * MIB, min(vmem_cap - 12 * MIB, int(vmem_cap * 0.82), 100 * MIB))


def _vmem_limit(need, vmem_cap):
    # Request what we actually need (+20%), never the full physical VMEM.
    return int(min(max(need * 12 // 10, 32 * MIB), vmem_cap - 8 * MIB))


# --------------------------------- kernels ------------------------------------


def _proj_head_kernel(x_ref, w_ref, o_ref):
    # One (rows, D) activation tile times one per-head (D, d_k) weight slice.
    x = x_ref[...].astype(w_ref.dtype)          # bf16 operands -> native MXU rate
    o_ref[...] = jnp.dot(x, w_ref[...],
                         preferred_element_type=jnp.float32).astype(o_ref.dtype)


def _flash_mha_kernel(*refs, h, has_mask, compute_dtype, exp_dtype):
    if has_mask:
        (bv_ref, qp_ref, kp_ref, vp_ref, bias_ref, wo_ref, o_ref,
         acc_s, m_s, l_s) = refs
    else:
        (qp_ref, kp_ref, vp_ref, wo_ref, o_ref, acc_s, m_s, l_s) = refs
        bv_ref = bias_ref = None

    ki = pl.program_id(2)
    n_k = pl.num_programs(2)

    @pl.when(ki == 0)
    def _init():
        m_s[...] = jnp.full_like(m_s, -jnp.inf)
        l_s[...] = jnp.zeros_like(l_s)
        acc_s[...] = jnp.zeros_like(acc_s)

    def _head_step(hd, carry):
        qh = qp_ref[hd]                                   # (tq, d_k) bf16, pre-scaled
        kh = kp_ref[hd]                                   # (tk, d_k) bf16
        s = lax.dot_general(qh, kh, (((1,), (1,)), ((), ())),
                            preferred_element_type=jnp.float32)      # (tq, tk) f32
        if has_mask:
            s = s + bias_ref[...]                         # additive mask bias (bf16)
        m_prev = m_s[hd]                                  # (tq, 1)
        m_new = jnp.maximum(m_prev, jnp.max(s, axis=-1, keepdims=True))
        alpha = jnp.exp(m_prev - m_new)
        # exp in bf16 on v6e/v7x (EUP bf16), f32 elsewhere.
        p = jnp.exp((s - m_new).astype(exp_dtype))
        l_s[hd] = alpha * l_s[hd] + jnp.sum(p, axis=-1, keepdims=True,
                                            dtype=jnp.float32)
        acc_s[hd] = alpha * acc_s[hd] + jnp.dot(
            p.astype(compute_dtype), vp_ref[hd],
            preferred_element_type=jnp.float32)
        m_s[hd] = m_new
        return carry

    def _run_heads():
        lax.fori_loop(0, h, _head_step, 0, unroll=True)

    if has_mask:
        # Skip fully-masked kv blocks (compute only; tiles were still prefetched).
        b = pl.program_id(0)
        qi = pl.program_id(1)
        nq = pl.num_programs(1)
        valid = bv_ref[(b * nq + qi) * n_k + ki] > 0
        pl.when(valid)(_run_heads)
    else:
        _run_heads()

    @pl.when(ki == n_k - 1)
    def _finalize():
        tq, D = o_ref.shape

        def _out_step(hd, o_acc):
            # Exact reciprocal; guard against fully-skipped rows (l == 0).
            inv_l = pl.reciprocal(jnp.maximum(l_s[hd], 1e-30), approx=False)
            ctx_h = (acc_s[hd] * inv_l).astype(compute_dtype)        # (tq, d_k)
            return o_acc + jnp.dot(ctx_h, wo_ref[hd],
                                   preferred_element_type=jnp.float32)

        o_ref[...] = lax.fori_loop(0, h, _out_step,
                                   jnp.zeros((tq, D), jnp.float32),
                                   unroll=True).astype(o_ref.dtype)


# --------------------------------- wrappers -----------------------------------


def _project_heads(x, w_heads, vmem_cap):
    """(B, S, D) @ per-head (h, D, d_k) weights -> (B, h, S, d_k) in w_heads.dtype."""
    B, S, D = x.shape
    h, _, d_k = w_heads.shape
    xs = jnp.dtype(x.dtype).itemsize
    ws = jnp.dtype(w_heads.dtype).itemsize
    budget = _vmem_budget(vmem_cap)

    def need(r):
        return (2 * r * D * xs          # x tile (double-buffered)
                + 2 * D * d_k * ws      # per-head weight slice (double-buffered)
                + 2 * r * d_k * ws      # out tile
                + r * D * ws            # bf16-cast temporary
                + r * d_k * 4)          # f32 matmul result temporary

    cands = [c for c in (1024, 512, 256, 128, 64, 32, 16, 8)
             if c <= S and S % c == 0] or [S]
    rows = cands[-1]
    for c in cands:
        if need(c) <= budget:
            rows = c
            break

    cost = pl.CostEstimate(flops=int(2 * B * S * D * D), transcendentals=0,
                           bytes_accessed=int(B * S * D * (xs + ws) + D * D * ws))

    return pl.pallas_call(
        _proj_head_kernel,
        out_shape=jax.ShapeDtypeStruct((B, h, S, d_k), w_heads.dtype),
        grid_spec=pltpu.PrefetchScalarGridSpec(
            num_scalar_prefetch=0,
            # h innermost: the x row-tile index does not change across heads, so
            # each activation tile is DMA'd once and reused for all h weight slices.
            grid=(B, S // rows, h),
            in_specs=[
                pl.BlockSpec((pl.Squeezed(), rows, D), lambda b, i, hd: (b, i, 0)),
                pl.BlockSpec((pl.Squeezed(), D, d_k), lambda b, i, hd: (hd, 0, 0)),
            ],
            out_specs=pl.BlockSpec((pl.Squeezed(), pl.Squeezed(), rows, d_k),
                                   lambda b, i, hd: (b, hd, i, 0)),
        ),
        compiler_params=pltpu.CompilerParams(
            dimension_semantics=("parallel", "parallel", "arbitrary"),
            vmem_limit_bytes=_vmem_limit(need(rows), vmem_cap)),
        cost_estimate=cost,
    )(x, w_heads)


def multi_head_attention(q, k, v, wq, wk, wv, wo, mask=None, *, h=8,
                         tq=None, tk=None):
    """q,k,v: [B,S,D]; weights PyTorch-style [D_out, D_in]; mask: [B,S_q,S_k] or None."""
    B, S_q, D = q.shape
    S_k = k.shape[1]
    assert D % h == 0, "d_model must be divisible by h"
    d_k = D // h
    scale = 1.0 / math.sqrt(d_k)
    out_dtype = q.dtype
    out_ds = jnp.dtype(out_dtype).itemsize
    compute_dtype = jnp.bfloat16
    cs = 2  # bf16 bytes
    has_mask = mask is not None

    gen = _tpu_generation()
    exp_dtype = jnp.bfloat16 if gen >= 6 else jnp.float32   # no bf16 EUP on v5e/older
    vmem_cap = _vmem_capacity_bytes()
    budget = _vmem_budget(vmem_cap)

    # One-time layout plumbing (outside the kernels):
    # PyTorch [out, in] -> per-head [h, D_in, d_k] (projections, scale folded into Wq)
    # and [h, d_k, D_out] (output projection, accumulated per head in the kernel).
    wq_h = (jnp.transpose(wq).reshape(D, h, d_k).transpose(1, 0, 2)
            * scale).astype(compute_dtype)
    wk_h = jnp.transpose(wk).reshape(D, h, d_k).transpose(1, 0, 2).astype(compute_dtype)
    wv_h = jnp.transpose(wv).reshape(D, h, d_k).transpose(1, 0, 2).astype(compute_dtype)
    wo_h = jnp.transpose(wo).reshape(h, d_k, D).astype(compute_dtype)

    # Per-head projection pre-pass (bf16): Q (scaled), K, V -> (B, h, S, d_k).
    qp = _project_heads(q, wq_h, vmem_cap)
    kp = _project_heads(k, wk_h, vmem_cap)
    vp = _project_heads(v, wv_h, vmem_cap)

    # ---- tile selection (generation-aware VMEM budget) ----
    def _flash_need(tq_, tk_):
        n = (2 * tq_ * D * cs            # qp tile (double-buffered; h*tq*d_k = tq*D)
             + 2 * 2 * tk_ * D * cs      # kp + vp tiles
             + 2 * D * D * cs            # wo_h (resident, double-buffered)
             + 2 * tq_ * D * out_ds      # output tile
             + tq_ * D * 4               # f32 context accumulator scratch
             + 2 * h * tq_ * 128 * 4     # m, l scratch (lane padded)
             + 4 * tq_ * tk_ * 4         # s / p / exp compiler temporaries
             + tq_ * D * 4)              # finalize f32 loop carry
        if has_mask:
            n += 2 * tq_ * tk_ * 2       # bias tile
        return n

    tq_cands = [c for c in (512, 256, 128, 64, 32, 16, 8)
                if c <= S_q and S_q % c == 0] or [S_q]
    tk_caps = (1024, 512, 256, 128) if has_mask else (1024, 512, 256, 128, 64, 32, 16, 8)
    tk_cands = [c for c in tk_caps if c <= S_k and S_k % c == 0] or [S_k]

    ti = kk = 0
    tq_sel, tk_sel = tq_cands[0], tk_cands[0]
    while _flash_need(tq_sel, tk_sel) > budget:
        if kk + 1 < len(tk_cands):       # shrink tk before tq
            kk += 1
        elif ti + 1 < len(tq_cands):
            ti += 1
        else:
            break
        tq_sel, tk_sel = tq_cands[ti], tk_cands[kk]
    # Megacore occupancy (v7x: 2 TCs fed by the parallel grid axes).
    if B * (S_q // tq_sel) < 2:
        for c in tq_cands:
            if S_q // c >= 2:
                tq_sel = c
                break
    if tq is None:
        tq = tq_sel
    if tk is None:
        tk = tk_sel
    assert S_q % tq == 0 and S_k % tk == 0, "tq / tk must divide the sequence lengths"
    if has_mask:
        assert tk % 128 == 0 or tk == S_k, "with a mask, tk must be a multiple of 128 or S_k"

    nq, nk = S_q // tq, S_k // tk

    inputs = []
    in_specs = [
        pl.BlockSpec((pl.Squeezed(), h, tq, d_k), lambda b, qi, ki, *_: (b, 0, qi, 0)),
        pl.BlockSpec((pl.Squeezed(), h, tk, d_k), lambda b, qi, ki, *_: (b, 0, ki, 0)),
        pl.BlockSpec((pl.Squeezed(), h, tk, d_k), lambda b, qi, ki, *_: (b, 0, ki, 0)),
    ]
    if has_mask:
        mask_bool = mask != 0
        # Additive bias (exact masked_fill semantics after softmax), bf16 DMA.
        bias = jnp.where(mask_bool, 0.0, -1e9).astype(compute_dtype)
        # Per-(b, q-tile, k-tile) "block has any valid key" table -> scalar prefetch.
        block_valid = mask_bool.reshape(B, nq, tq, nk, tk).any(axis=(2, 4))
        block_valid = block_valid.reshape(-1).astype(jnp.int32)
        inputs.append(block_valid)
        in_specs.append(
            pl.BlockSpec((pl.Squeezed(), tq, tk), lambda b, qi, ki, *_: (b, qi, ki)))
    inputs += [qp, kp, vp]
    if has_mask:
        inputs.insert(4, bias)   # order: block_valid, qp, kp, vp, bias, wo_h
    in_specs.append(pl.BlockSpec((h, d_k, D), lambda b, qi, ki, *_: (0, 0, 0)))
    inputs.append(wo_h)

    # Re-order in_specs to match (qp, kp, vp, [bias], wo_h).
    if has_mask:
        bias_spec = in_specs.pop(3)
        in_specs = in_specs[:3] + [bias_spec] + in_specs[3:]

    need = _flash_need(tq, tk)

    flops = 4 * B * S_q * S_k * D + 2 * B * S_q * D * D
    bytes_accessed = (B * S_q * D * cs + 2 * B * nq * S_k * D * cs
                      + B * S_q * D * out_ds + 2 * D * D * cs)
    if has_mask:
        bytes_accessed += B * S_q * S_k * 2
    cost = pl.CostEstimate(flops=int(flops),
                           transcendentals=int(B * h * S_q * S_k),
                           bytes_accessed=int(bytes_accessed))

    kernel = functools.partial(_flash_mha_kernel, h=h, has_mask=has_mask,
                               compute_dtype=compute_dtype, exp_dtype=exp_dtype)

    return pl.pallas_call(
        kernel,
        out_shape=jax.ShapeDtypeStruct((B, S_q, D), out_dtype),
        grid_spec=pltpu.PrefetchScalarGridSpec(
            num_scalar_prefetch=1 if has_mask else 0,
            grid=(B, nq, nk),
            in_specs=in_specs,
            out_specs=pl.BlockSpec((pl.Squeezed(), tq, D),
                                   lambda b, qi, ki, *_: (b, qi, 0)),
            scratch_shapes=[
                pltpu.VMEM((h, tq, d_k), jnp.float32),   # un-normalized context acc
                pltpu.VMEM((h, tq, 1), jnp.float32),     # running max (per head)
                pltpu.VMEM((h, tq, 1), jnp.float32),     # running denom (per head)
            ]),
        compiler_params=pltpu.CompilerParams(
            dimension_semantics=("parallel", "parallel", "arbitrary"),
            vmem_limit_bytes=_vmem_limit(need, vmem_cap)),
        cost_estimate=cost,
    )(*inputs)


# --------------------------------- reference ----------------------------------


def _reference(q, k, v, wq, wk, wv, wo, mask, h):
    """Pure-JAX reference mirroring the PyTorch forward."""
    B, S_q, D = q.shape
    d_k = D // h
    qp = (q @ wq.T).reshape(B, S_q, h, d_k).transpose(0, 2, 1, 3)
    kp = (k @ wk.T).reshape(B, k.shape[1], h, d_k).transpose(0, 2, 1, 3)
    vp = (v @ wv.T).reshape(B, v.shape[1], h, d_k).transpose(0, 2, 1, 3)
    scores = jnp.einsum('bhqd,bhkd->bhqk', qp, kp) / math.sqrt(d_k)
    if mask is not None:
        scores = jnp.where(mask[:, None, :, :] == 0, -1e9, scores)
    p = jax.nn.softmax(scores, axis=-1)
    ctx = jnp.einsum('bhqk,bhkd->bhqd', p, vp)
    ctx = ctx.transpose(0, 2, 1, 3).reshape(B, S_q, D)
    return ctx @ wo.T


if __name__ == "__main__":
    key = jax.random.PRNGKey(0)

    # ---- Test 1: masked, small shapes (single tile per batch element) ----
    B, S, d_model, h = 2, 8, 32, 8
    kq, kk, kv_, k1, k2, k3, k4 = jax.random.split(key, 7)

    q = jax.random.normal(kq, (B, S, d_model), dtype=jnp.float32)
    k = jax.random.normal(kk, (B, S, d_model), dtype=jnp.float32)
    v = jax.random.normal(kv_, (B, S, d_model), dtype=jnp.float32)

    bound = 1.0 / math.sqrt(d_model)
    wq = jax.random.uniform(k1, (d_model, d_model), minval=-bound, maxval=bound)
    wk = jax.random.uniform(k2, (d_model, d_model), minval=-bound, maxval=bound)
    wv = jax.random.uniform(k3, (d_model, d_model), minval=-bound, maxval=bound)
    wo = jax.random.uniform(k4, (d_model, d_model), minval=-bound, maxval=bound)

    # Padding-style mask: zero out the last two key positions of batch 1.
    mask = jnp.ones((B, S, S), dtype=jnp.float32)
    mask = mask.at[1, :, -2:].set(0.0)

    out = jax.block_until_ready(
        multi_head_attention(q, k, v, wq, wk, wv, wo, mask=mask, h=h))
    ref = _reference(q, k, v, wq, wk, wv, wo, mask, h)
    assert out.shape == (B, S, d_model)
    # bf16 MXU operands / bf16 exp -> bf16-level tolerance.
    assert jnp.allclose(out, ref, atol=5e-2, rtol=5e-2)

    # ---- Test 2: no mask, forced small tiles to exercise the online softmax
    #      across multiple (q, kv) tiles of the flash grid ----
    B2, S2, d2, h2 = 2, 32, 128, 8
    kq2, kk2, kv2, k5, k6, k7, k8 = jax.random.split(jax.random.PRNGKey(1), 7)
    q2 = jax.random.normal(kq2, (B2, S2, d2), dtype=jnp.float32)
    k2_ = jax.random.normal(kk2, (B2, S2, d2), dtype=jnp.float32)
    v2 = jax.random.normal(kv2, (B2, S2, d2), dtype=jnp.float32)
    bound2 = 1.0 / math.sqrt(d2)
    wq2 = jax.random.uniform(k5, (d2, d2), minval=-bound2, maxval=bound2)
    wk2 = jax.random.uniform(k6, (d2, d2), minval=-bound2, maxval=bound2)
    wv2 = jax.random.uniform(k7, (d2, d2), minval=-bound2, maxval=bound2)
    wo2 = jax.random.uniform(k8, (d2, d2), minval=-bound2, maxval=bound2)

    out2 = jax.block_until_ready(
        multi_head_attention(q2, k2_, v2, wq2, wk2, wv2, wo2, mask=None, h=h2,
                             tq=16, tk=8))
    ref2 = _reference(q2, k2_, v2, wq2, wk2, wv2, wo2, None, h2)
    assert out2.shape == (B2, S2, d2)
    assert jnp.allclose(out2, ref2, atol=5e-2, rtol=5e-2)

    print("KERNEL_OK")
</pallas_src>

<mosaic_0001>
module attributes {stable_mosaic.version = 11 : i64} {
  func.func @_proj_head_kernel(%arg0: i32, %arg1: i32, %arg2: i32, %arg3: memref<1x8x32xf32, #tpu.memory_space<vmem>>, %arg4: memref<1x32x4xbf16, #tpu.memory_space<vmem>>, %arg5: memref<1x1x8x4xbf16, #tpu.memory_space<vmem>>) attributes {dimension_semantics = [#tpu.dimension_semantics<parallel>, #tpu.dimension_semantics<parallel>, #tpu.dimension_semantics<arbitrary>], iteration_bounds = array<i64: 2, 1, 8>, scalar_prefetch = 0 : i64, scratch_operands = 0 : i64, tpu.core_type = #tpu.core_type<tc>, window_params = [{transform_indices = @transform_0, window_bounds = array<i64: 1, 8, 32>}, {transform_indices = @transform_1, window_bounds = array<i64: 1, 32, 4>}, {transform_indices = @transform_2, window_bounds = array<i64: 1, 1, 8, 4>}]} {
    %c0 = arith.constant 0 : index
    %c0_0 = arith.constant 0 : index
    %c0_1 = arith.constant 0 : index
    %0 = vector.load %arg3[%c0, %c0_0, %c0_1] : memref<1x8x32xf32, #tpu.memory_space<vmem>>, vector<1x8x32xf32>
    %1 = vector.shape_cast %0 : vector<1x8x32xf32> to vector<8x32xf32>
    %2 = arith.truncf %1 : vector<8x32xf32> to vector<8x32xbf16>
    %c0_2 = arith.constant 0 : index
    %c0_3 = arith.constant 0 : index
    %c0_4 = arith.constant 0 : index
    %3 = vector.load %arg4[%c0_2, %c0_3, %c0_4] : memref<1x32x4xbf16, #tpu.memory_space<vmem>>, vector<1x32x4xbf16>
    %4 = vector.shape_cast %3 : vector<1x32x4xbf16> to vector<32x4xbf16>
    %cst = arith.constant dense<0.000000e+00> : vector<8x4xf32>
    %5 = tpu.matmul %2, %4, %cst {dimension_numbers = #tpu.dot_dimension_numbers<[1], [0], [0], [1], [0, 0, 1, 1], [], []>} : vector<8x32xbf16>, vector<32x4xbf16>, vector<8x4xf32> -> vector<8x4xf32>
    %6 = arith.truncf %5 : vector<8x4xf32> to vector<8x4xbf16>
    %c0_5 = arith.constant 0 : index
    %c0_6 = arith.constant 0 : index
    %c0_7 = arith.constant 0 : index
    %c0_8 = arith.constant 0 : index
    %7 = vector.load %arg5[%c0_5, %c0_6, %c0_7, %c0_8] : memref<1x1x8x4xbf16, #tpu.memory_space<vmem>>, vector<1x1x8x4xbf16>
    %8 = vector.shape_cast %7 : vector<1x1x8x4xbf16> to vector<8x4xbf16>
    %9 = vector.shape_cast %6 : vector<8x4xbf16> to vector<1x1x8x4xbf16>
    tpu.vector_store %arg5[%c0_5, %c0_6, %c0_7, %c0_8], %9 {strides = array<i32>} : memref<1x1x8x4xbf16, #tpu.memory_space<vmem>>, vector<1x1x8x4xbf16>,
    return
  }
  func.func @transform_0(%arg0: i32, %arg1: i32, %arg2: i32) -> (i32, i32, i32) {
    %c0_i32 = arith.constant 0 : i32
    %c0_i32_0 = arith.constant 0 : i32
    return %arg0, %arg1, %c0_i32 : i32, i32, i32
  }
  func.func @transform_1(%arg0: i32, %arg1: i32, %arg2: i32) -> (i32, i32, i32) {
    %c0_i32 = arith.constant 0 : i32
    %c0_i32_0 = arith.constant 0 : i32
    %c0_i32_1 = arith.constant 0 : i32
    return %arg2, %c0_i32, %c0_i32_0 : i32, i32, i32
  }
  func.func @transform_2(%arg0: i32, %arg1: i32, %arg2: i32) -> (i32, i32, i32, i32) {
    %c0_i32 = arith.constant 0 : i32
    %c0_i32_0 = arith.constant 0 : i32
    return %arg0, %arg2, %arg1, %c0_i32 : i32, i32, i32, i32
  }
}

</mosaic_0001>

<bundles_post_ra>
// kernel: tpu_custom_call.1
= control target key start
LH: loop header
LB: loop body
LE: loop exit
PB: predicated region body
PF: predicated region fallthrough
CT: control target
= control target key end

     0   :  { %s473_s9 = smov 0   ;;  %s475_s10 = smov 0   ;;  %s527_s0 = inlined_call_operand.vmem [shape: f32[2,8,32], index: 0, kind: input, shape index: {}]   ;;  %s528_s1 = inlined_call_operand.vmem [shape: bf16[8,32,4], index: 1, kind: input, shape index: {}]   ;;  %s529_s2 = inlined_call_operand.vmem [shape: bf16[2,8,8,4], index: 2, kind: output, shape index: {}]  }
   0x1   :  { %s477_s11 = smov 0   ;;  %s479_s12 = smov 0  }
   0x2   :  { %s481_s13 = smov 0  }
   0x3 LB: > { %s24_s14 = sadd.s32 1, %s448_s11  ;;  %s31_s15 = sadd.s32 1, %s452_s12  ;;  %s456_s13 = sphi %s481_s13, %s12_s13   ;;  %s452_s12 = sphi %s479_s12, %s533_s12   ;;  %s448_s11 = sphi %s477_s11, %s532_s11   ;;  %s444_s10 = sphi %s475_s10, %s531_s10   ;;  %s440_s9 = sphi %s473_s9, %s530_s9  }
   0x4   : > { %p25_p0 = scmp.ge.s32.totalorder %s24_s14, 8  ;;  %p358_p1 = scmp.ge.s32.totalorder %s456_s13, 1 }
   0x5   : > { %p149_p2 = scmp.lt.s32.totalorder %s456_s13, 17 }
   0x6   : > { %s535_s14 = smov (%p25_p0, %s24_s14), 0  ;;  %s537_s15 = smov (!%p25_p0, %s31_s15), %s452_s12 }
   0x7   : > { %p150_p3 = pnand %p358_p1, %p149_p2  ;;  %p33_p4 = scmp.ge.s32.totalorder %s537_s15, 2 }
   0x8   : > { %p191_p5 = scmp.lt.s32.totalorder (!%p150_p3), %s440_s9, 7  ;;  %p184_p6 = scmp.lt.s32.totalorder (!%p150_p3), %s444_s10, 1 }
   0x9   : > { %s539_s15 = smov (%p33_p4, %s537_s15), 0  ;;  %153 = sbr.rel (%p150_p3) target bundleno = 159 (0x9f), region = 28 }
   0xe   : > { %s541_s9 = smov (!%p191_p5, %s440_s9), 7  ;;  %s543_s10 = smov (!%p184_p6, %s444_s10), 1  ;;  %vm226_vm0 = vcmask 261120   ;;  %vm244_vm1 = vcmask 27648  }
   0xf   : > { %s375_s16 = sshll.u32 %s541_s9, 4  ;;  %s359_s20 = sshll.u32 %s543_s10, 3 }
  0x10   : > { %s195_s19 = scalar_lea.vmem %s528_s1, %s375_s16  ;;  %s190_s23 = scalar_lea.vmem %s527_s0, %s359_s20 }
  0x11   : > { %v377_v0 = vld [vmem:[%s195_s19 + $0x8] sm:$0xff]  ;;  %s204_s24 = sadd.s32 %s359_s20, %s541_s9  ;;  %v376_v1 = vld [vmem:[%s195_s19] sm:$0xff] }
  0x12   : > { %236 = vmatpush.bf16.msra.mxu0 %v377_v0  ;;  %v208_v2 = vld [vmem:[%s190_s23] sm:$0xff]  ;;  %s363_s25 = sshll.u32 %s204_s24, 2 }
  0x13   : > { %v209_v3 = vpack.c.bf16 %v208_v2, %v208_v2  ;;  %s206_s28 = scalar_lea.vmem %s529_s2, %s363_s25 }
  0x16   : > { %237 = vmatpush.bf16.msra.mxu0 %v376_v1 }
  0x19   : > { %372 = vmatmul.msk.bf16.vlgmr.msra.gmra.mxu0 %vm226_vm0, %v209_v3 }
  0x96   : > { %v239_v4 = vpop.f32.mrf.mxu0 }
  0x97   : > { %v243_v5 = vpack.c.bf16 %v239_v4, %v239_v4 }
  0x99   : > { %245 = vst.msk [vmem:[%s206_s28] sm:$0xf] %vm244_vm1, %v243_v5 }
  0x9e   : > { %v241_v6 = vpop.f32.mrf.mxu0 }
  0x9f PF: > { %s12_s13 = sadd.s32 1, %s456_s13   ;;  %s530_s9 = smov %s448_s11 }
  0xa0   : > { %p9_p7 = scmp.ge.s32.totalorder %s12_s13, 18   ;;  %s531_s10 = smov %s452_s12 }
  0xa1   : > { %s532_s11 = smov %s535_s14  ;;  %s533_s12 = smov %s539_s15 }
  0xa2   :  { %11 = sbr.rel (!%p9_p7) target bundleno = 3 (0x3), region = 61 }

</bundles_post_ra>
